<compile_context>
chip_gen: v7x
topology: tpu7x:2x2x1
jax: 0.10.0
libtpu: 0.0.40
codegen_flags: <defaults>
</compile_context>

<pallas_src>
import jax
import jax.numpy as jnp
from jax.experimental import pallas as pl
from jax.experimental.pallas import tpu as pltpu


def _conv1x1_hardsig_kernel(w_ref, b_ref, x_ref, o_ref):
    """VPU-only 1x1 conv (over zero-padded input) + hard-sigmoid.

    w_ref : SMEM (Cout*Cin,) f32 weights, pre-scaled by 1/6
    b_ref : SMEM (Cout,)     f32 bias, pre-folded as (bias + 3) / 6
    x_ref : VMEM (N, Cin, Hp, Wp) f32 zero-padded input
    o_ref : VMEM (N, Cout, Hp, Wp) f32 final output
    """
    n_batch, c_in = x_ref.shape[0], x_ref.shape[1]
    c_out = o_ref.shape[1]

    # Hoist all scalar reads (SMEM sld + scalar->vector splat) out of the
    # batch/channel loops: issued once, reused for every batch element.
    w = [[w_ref[c * c_in + k] for k in range(c_in)] for c in range(c_out)]
    b = [b_ref[c] for c in range(c_out)]

    for n in range(n_batch):
        # One lane-dense (Hp, Wp) slab per input channel, loaded once.
        xs = [x_ref[n, k] for k in range(c_in)]
        for c in range(c_out):
            acc = b[c] + w[c][0] * xs[0]          # bias (+3)/6 folded into init
            for k in range(1, c_in):
                acc = acc + w[c][k] * xs[k]
            # 1/6 already folded into w/b -> hard-sigmoid is just a clamp to [0,1].
            o_ref[n, c] = jnp.clip(acc, 0.0, 1.0).astype(o_ref.dtype)


def model_forward(x, weight, bias):
    """x: (N, Cin, H, W); weight: (Cout, Cin[,1,1]); bias: (Cout,)."""
    if weight.ndim == 4:                       # PyTorch Conv2d stores (Cout, Cin, 1, 1)
        weight = weight.reshape(weight.shape[0], weight.shape[1])

    N, Cin, H, W = x.shape
    Cout = weight.shape[0]
    Hp, Wp = H + 2, W + 2

    # Single cheap wrapper op: zero-pad the input (padding=1).  The kernel then
    # produces the final padded output with fully aligned full-slab stores.
    xp = jnp.pad(x.astype(jnp.float32), ((0, 0), (0, 0), (1, 1), (1, 1)))

    w = (weight.astype(jnp.float32) * (1.0 / 6.0)).reshape(-1)   # (Cout*Cin,) flat SMEM
    b = (bias.astype(jnp.float32) + 3.0) * (1.0 / 6.0)           # (Cout,)

    cost = pl.CostEstimate(
        flops=N * Cout * Hp * Wp * (2 * Cin + 2),
        transcendentals=0,
        bytes_accessed=(xp.size + N * Cout * Hp * Wp + w.size + b.size) * 4,
    )

    out = pl.pallas_call(
        _conv1x1_hardsig_kernel,
        out_shape=jax.ShapeDtypeStruct((N, Cout, Hp, Wp), jnp.float32),
        in_specs=[
            pl.BlockSpec(memory_space=pltpu.MemorySpace.SMEM),   # weights (flat)
            pl.BlockSpec(memory_space=pltpu.MemorySpace.SMEM),   # bias ((b+3)/6)
            pl.BlockSpec(memory_space=pltpu.MemorySpace.VMEM),   # padded x
        ],
        out_specs=pl.BlockSpec(memory_space=pltpu.MemorySpace.VMEM),
        cost_estimate=cost,
    )(w, b, xp)
    return out


if __name__ == "__main__":
    key = jax.random.PRNGKey(0)
    k_x, k_w, k_b = jax.random.split(key, 3)

    # Shapes from the module spec: x1 = torch.randn(1, 3, 64, 64), Conv2d(3, 8, 1, padding=1)
    N, Cin, H, W = 1, 3, 64, 64
    Cout = 8

    x = jax.random.normal(k_x, (N, Cin, H, W), dtype=jnp.float32)
    # nn.Conv2d default init: uniform(-1/sqrt(fan_in), 1/sqrt(fan_in)), fan_in = Cin*1*1
    bound = 1.0 / (Cin ** 0.5)
    weight = jax.random.uniform(k_w, (Cout, Cin, 1, 1), jnp.float32, -bound, bound)
    bias = jax.random.uniform(k_b, (Cout,), jnp.float32, -bound, bound)

    out = jax.block_until_ready(model_forward(x, weight, bias))
    assert out.shape == (N, Cout, H + 2, W + 2), out.shape

    # Pure-JAX reference (zero-pad then 1x1 conv + hardsigmoid).
    xp_ref = jnp.pad(x, ((0, 0), (0, 0), (1, 1), (1, 1)))
    w2 = weight.reshape(Cout, Cin)
    ref = jnp.clip(jnp.einsum("oc,nchw->nohw", w2, xp_ref)
                   + bias[None, :, None, None] + 3.0, 0.0, 6.0) / 6.0
    assert jnp.allclose(out, ref, atol=1e-5, rtol=1e-5), \
        float(jnp.max(jnp.abs(out - ref)))

    print("KERNEL_OK")
</pallas_src>

<mosaic_0001>
module attributes {stable_mosaic.version = 11 : i64} {
  func.func @_conv1x1_hardsig_kernel(%arg0: memref<24xf32, #tpu.memory_space<smem>>, %arg1: memref<8xf32, #tpu.memory_space<smem>>, %arg2: memref<1x3x66x66xf32, #tpu.memory_space<vmem>>, %arg3: memref<1x8x66x66xf32, #tpu.memory_space<vmem>>) attributes {dimension_semantics = [], scalar_prefetch = 0 : i64, scratch_operands = 0 : i64, tpu.core_type = #tpu.core_type<tc>} {
    %c0 = arith.constant 0 : index
    %0 = memref.load %arg0[%c0] : memref<24xf32, #tpu.memory_space<smem>>
    %c1 = arith.constant 1 : index
    %1 = memref.load %arg0[%c1] : memref<24xf32, #tpu.memory_space<smem>>
    %c2 = arith.constant 2 : index
    %2 = memref.load %arg0[%c2] : memref<24xf32, #tpu.memory_space<smem>>
    %c3 = arith.constant 3 : index
    %3 = memref.load %arg0[%c3] : memref<24xf32, #tpu.memory_space<smem>>
    %c4 = arith.constant 4 : index
    %4 = memref.load %arg0[%c4] : memref<24xf32, #tpu.memory_space<smem>>
    %c5 = arith.constant 5 : index
    %5 = memref.load %arg0[%c5] : memref<24xf32, #tpu.memory_space<smem>>
    %c6 = arith.constant 6 : index
    %6 = memref.load %arg0[%c6] : memref<24xf32, #tpu.memory_space<smem>>
    %c7 = arith.constant 7 : index
    %7 = memref.load %arg0[%c7] : memref<24xf32, #tpu.memory_space<smem>>
    %c8 = arith.constant 8 : index
    %8 = memref.load %arg0[%c8] : memref<24xf32, #tpu.memory_space<smem>>
    %c9 = arith.constant 9 : index
    %9 = memref.load %arg0[%c9] : memref<24xf32, #tpu.memory_space<smem>>
    %c10 = arith.constant 10 : index
    %10 = memref.load %arg0[%c10] : memref<24xf32, #tpu.memory_space<smem>>
    %c11 = arith.constant 11 : index
    %11 = memref.load %arg0[%c11] : memref<24xf32, #tpu.memory_space<smem>>
    %c12 = arith.constant 12 : index
    %12 = memref.load %arg0[%c12] : memref<24xf32, #tpu.memory_space<smem>>
    %c13 = arith.constant 13 : index
    %13 = memref.load %arg0[%c13] : memref<24xf32, #tpu.memory_space<smem>>
    %c14 = arith.constant 14 : index
    %14 = memref.load %arg0[%c14] : memref<24xf32, #tpu.memory_space<smem>>
    %c15 = arith.constant 15 : index
    %15 = memref.load %arg0[%c15] : memref<24xf32, #tpu.memory_space<smem>>
    %c16 = arith.constant 16 : index
    %16 = memref.load %arg0[%c16] : memref<24xf32, #tpu.memory_space<smem>>
    %c17 = arith.constant 17 : index
    %17 = memref.load %arg0[%c17] : memref<24xf32, #tpu.memory_space<smem>>
    %c18 = arith.constant 18 : index
    %18 = memref.load %arg0[%c18] : memref<24xf32, #tpu.memory_space<smem>>
    %c19 = arith.constant 19 : index
    %19 = memref.load %arg0[%c19] : memref<24xf32, #tpu.memory_space<smem>>
    %c20 = arith.constant 20 : index
    %20 = memref.load %arg0[%c20] : memref<24xf32, #tpu.memory_space<smem>>
    %c21 = arith.constant 21 : index
    %21 = memref.load %arg0[%c21] : memref<24xf32, #tpu.memory_space<smem>>
    %c22 = arith.constant 22 : index
    %22 = memref.load %arg0[%c22] : memref<24xf32, #tpu.memory_space<smem>>
    %c23 = arith.constant 23 : index
    %23 = memref.load %arg0[%c23] : memref<24xf32, #tpu.memory_space<smem>>
    %c0_0 = arith.constant 0 : index
    %24 = memref.load %arg1[%c0_0] : memref<8xf32, #tpu.memory_space<smem>>
    %c1_1 = arith.constant 1 : index
    %25 = memref.load %arg1[%c1_1] : memref<8xf32, #tpu.memory_space<smem>>
    %c2_2 = arith.constant 2 : index
    %26 = memref.load %arg1[%c2_2] : memref<8xf32, #tpu.memory_space<smem>>
    %c3_3 = arith.constant 3 : index
    %27 = memref.load %arg1[%c3_3] : memref<8xf32, #tpu.memory_space<smem>>
    %c4_4 = arith.constant 4 : index
    %28 = memref.load %arg1[%c4_4] : memref<8xf32, #tpu.memory_space<smem>>
    %c5_5 = arith.constant 5 : index
    %29 = memref.load %arg1[%c5_5] : memref<8xf32, #tpu.memory_space<smem>>
    %c6_6 = arith.constant 6 : index
    %30 = memref.load %arg1[%c6_6] : memref<8xf32, #tpu.memory_space<smem>>
    %c7_7 = arith.constant 7 : index
    %31 = memref.load %arg1[%c7_7] : memref<8xf32, #tpu.memory_space<smem>>
    %c0_8 = arith.constant 0 : index
    %c0_9 = arith.constant 0 : index
    %c0_10 = arith.constant 0 : index
    %c0_11 = arith.constant 0 : index
    %32 = vector.load %arg2[%c0_8, %c0_9, %c0_10, %c0_11] : memref<1x3x66x66xf32, #tpu.memory_space<vmem>>, vector<1x1x66x66xf32>
    %33 = vector.shape_cast %32 : vector<1x1x66x66xf32> to vector<66x66xf32>
    %c0_12 = arith.constant 0 : index
    %c1_13 = arith.constant 1 : index
    %c0_14 = arith.constant 0 : index
    %c0_15 = arith.constant 0 : index
    %34 = vector.load %arg2[%c0_12, %c1_13, %c0_14, %c0_15] : memref<1x3x66x66xf32, #tpu.memory_space<vmem>>, vector<1x1x66x66xf32>
    %35 = vector.shape_cast %34 : vector<1x1x66x66xf32> to vector<66x66xf32>
    %c0_16 = arith.constant 0 : index
    %c2_17 = arith.constant 2 : index
    %c0_18 = arith.constant 0 : index
    %c0_19 = arith.constant 0 : index
    %36 = vector.load %arg2[%c0_16, %c2_17, %c0_18, %c0_19] : memref<1x3x66x66xf32, #tpu.memory_space<vmem>>, vector<1x1x66x66xf32>
    %37 = vector.shape_cast %36 : vector<1x1x66x66xf32> to vector<66x66xf32>
    %38 = vector.broadcast %0 : f32 to vector<66x66xf32>
    %39 = arith.mulf %38, %33 : vector<66x66xf32>
    %40 = vector.broadcast %24 : f32 to vector<66x66xf32>
    %41 = arith.addf %40, %39 : vector<66x66xf32>
    %42 = vector.broadcast %1 : f32 to vector<66x66xf32>
    %43 = arith.mulf %42, %35 : vector<66x66xf32>
    %44 = arith.addf %41, %43 : vector<66x66xf32>
    %45 = vector.broadcast %2 : f32 to vector<66x66xf32>
    %46 = arith.mulf %45, %37 : vector<66x66xf32>
    %47 = arith.addf %44, %46 : vector<66x66xf32>
    %cst = arith.constant 0.000000e+00 : f32
    %cst_20 = arith.constant 1.000000e+00 : f32
    %48 = vector.broadcast %cst : f32 to vector<66x66xf32>
    %49 = arith.maximumf %48, %47 : vector<66x66xf32>
    %50 = vector.broadcast %cst_20 : f32 to vector<66x66xf32>
    %51 = arith.minimumf %50, %49 : vector<66x66xf32>
    %c0_21 = arith.constant 0 : index
    %c0_22 = arith.constant 0 : index
    %c0_23 = arith.constant 0 : index
    %c0_24 = arith.constant 0 : index
    %52 = vector.load %arg3[%c0_21, %c0_22, %c0_23, %c0_24] : memref<1x8x66x66xf32, #tpu.memory_space<vmem>>, vector<1x1x66x66xf32>
    %53 = vector.shape_cast %52 : vector<1x1x66x66xf32> to vector<66x66xf32>
    %54 = vector.shape_cast %51 : vector<66x66xf32> to vector<1x1x66x66xf32>
    tpu.vector_store %arg3[%c0_21, %c0_22, %c0_23, %c0_24], %54 {strides = array<i32>} : memref<1x8x66x66xf32, #tpu.memory_space<vmem>>, vector<1x1x66x66xf32>,
    %55 = vector.broadcast %3 : f32 to vector<66x66xf32>
    %56 = arith.mulf %55, %33 : vector<66x66xf32>
    %57 = vector.broadcast %25 : f32 to vector<66x66xf32>
    %58 = arith.addf %57, %56 : vector<66x66xf32>
    %59 = vector.broadcast %4 : f32 to vector<66x66xf32>
    %60 = arith.mulf %59, %35 : vector<66x66xf32>
    %61 = arith.addf %58, %60 : vector<66x66xf32>
    %62 = vector.broadcast %5 : f32 to vector<66x66xf32>
    %63 = arith.mulf %62, %37 : vector<66x66xf32>
    %64 = arith.addf %61, %63 : vector<66x66xf32>
    %cst_25 = arith.constant 0.000000e+00 : f32
    %cst_26 = arith.constant 1.000000e+00 : f32
    %65 = vector.broadcast %cst_25 : f32 to vector<66x66xf32>
    %66 = arith.maximumf %65, %64 : vector<66x66xf32>
    %67 = vector.broadcast %cst_26 : f32 to vector<66x66xf32>
    %68 = arith.minimumf %67, %66 : vector<66x66xf32>
    %c0_27 = arith.constant 0 : index
    %c1_28 = arith.constant 1 : index
    %c0_29 = arith.constant 0 : index
    %c0_30 = arith.constant 0 : index
    %69 = vector.load %arg3[%c0_27, %c1_28, %c0_29, %c0_30] : memref<1x8x66x66xf32, #tpu.memory_space<vmem>>, vector<1x1x66x66xf32>
    %70 = vector.shape_cast %69 : vector<1x1x66x66xf32> to vector<66x66xf32>
    %71 = vector.shape_cast %68 : vector<66x66xf32> to vector<1x1x66x66xf32>
    tpu.vector_store %arg3[%c0_27, %c1_28, %c0_29, %c0_30], %71 {strides = array<i32>} : memref<1x8x66x66xf32, #tpu.memory_space<vmem>>, vector<1x1x66x66xf32>,
    %72 = vector.broadcast %6 : f32 to vector<66x66xf32>
    %73 = arith.mulf %72, %33 : vector<66x66xf32>
    %74 = vector.broadcast %26 : f32 to vector<66x66xf32>
    %75 = arith.addf %74, %73 : vector<66x66xf32>
    %76 = vector.broadcast %7 : f32 to vector<66x66xf32>
    %77 = arith.mulf %76, %35 : vector<66x66xf32>
    %78 = arith.addf %75, %77 : vector<66x66xf32>
    %79 = vector.broadcast %8 : f32 to vector<66x66xf32>
    %80 = arith.mulf %79, %37 : vector<66x66xf32>
    %81 = arith.addf %78, %80 : vector<66x66xf32>
    %cst_31 = arith.constant 0.000000e+00 : f32
    %cst_32 = arith.constant 1.000000e+00 : f32
    %82 = vector.broadcast %cst_31 : f32 to vector<66x66xf32>
    %83 = arith.maximumf %82, %81 : vector<66x66xf32>
    %84 = vector.broadcast %cst_32 : f32 to vector<66x66xf32>
    %85 = arith.minimumf %84, %83 : vector<66x66xf32>
    %c0_33 = arith.constant 0 : index
    %c2_34 = arith.constant 2 : index
    %c0_35 = arith.constant 0 : index
    %c0_36 = arith.constant 0 : index
    %86 = vector.load %arg3[%c0_33, %c2_34, %c0_35, %c0_36] : memref<1x8x66x66xf32, #tpu.memory_space<vmem>>, vector<1x1x66x66xf32>
    %87 = vector.shape_cast %86 : vector<1x1x66x66xf32> to vector<66x66xf32>
    %88 = vector.shape_cast %85 : vector<66x66xf32> to vector<1x1x66x66xf32>
    tpu.vector_store %arg3[%c0_33, %c2_34, %c0_35, %c0_36], %88 {strides = array<i32>} : memref<1x8x66x66xf32, #tpu.memory_space<vmem>>, vector<1x1x66x66xf32>,
    %89 = vector.broadcast %9 : f32 to vector<66x66xf32>
    %90 = arith.mulf %89, %33 : vector<66x66xf32>
    %91 = vector.broadcast %27 : f32 to vector<66x66xf32>
    %92 = arith.addf %91, %90 : vector<66x66xf32>
    %93 = vector.broadcast %10 : f32 to vector<66x66xf32>
    %94 = arith.mulf %93, %35 : vector<66x66xf32>
    %95 = arith.addf %92, %94 : vector<66x66xf32>
    %96 = vector.broadcast %11 : f32 to vector<66x66xf32>
    %97 = arith.mulf %96, %37 : vector<66x66xf32>
    %98 = arith.addf %95, %97 : vector<66x66xf32>
    %cst_37 = arith.constant 0.000000e+00 : f32
    %cst_38 = arith.constant 1.000000e+00 : f32
    %99 = vector.broadcast %cst_37 : f32 to vector<66x66xf32>
    %100 = arith.maximumf %99, %98 : vector<66x66xf32>
    %101 = vector.broadcast %cst_38 : f32 to vector<66x66xf32>
    %102 = arith.minimumf %101, %100 : vector<66x66xf32>
    %c0_39 = arith.constant 0 : index
    %c3_40 = arith.constant 3 : index
    %c0_41 = arith.constant 0 : index
    %c0_42 = arith.constant 0 : index
    %103 = vector.load %arg3[%c0_39, %c3_40, %c0_41, %c0_42] : memref<1x8x66x66xf32, #tpu.memory_space<vmem>>, vector<1x1x66x66xf32>
    %104 = vector.shape_cast %103 : vector<1x1x66x66xf32> to vector<66x66xf32>
    %105 = vector.shape_cast %102 : vector<66x66xf32> to vector<1x1x66x66xf32>
    tpu.vector_store %arg3[%c0_39, %c3_40, %c0_41, %c0_42], %105 {strides = array<i32>} : memref<1x8x66x66xf32, #tpu.memory_space<vmem>>, vector<1x1x66x66xf32>,
    %106 = vector.broadcast %12 : f32 to vector<66x66xf32>
    %107 = arith.mulf %106, %33 : vector<66x66xf32>
    %108 = vector.broadcast %28 : f32 to vector<66x66xf32>
    %109 = arith.addf %108, %107 : vector<66x66xf32>
    %110 = vector.broadcast %13 : f32 to vector<66x66xf32>
    %111 = arith.mulf %110, %35 : vector<66x66xf32>
    %112 = arith.addf %109, %111 : vector<66x66xf32>
    %113 = vector.broadcast %14 : f32 to vector<66x66xf32>
    %114 = arith.mulf %113, %37 : vector<66x66xf32>
    %115 = arith.addf %112, %114 : vector<66x66xf32>
    %cst_43 = arith.constant 0.000000e+00 : f32
    %cst_44 = arith.constant 1.000000e+00 : f32
    %116 = vector.broadcast %cst_43 : f32 to vector<66x66xf32>
    %117 = arith.maximumf %116, %115 : vector<66x66xf32>
    %118 = vector.broadcast %cst_44 : f32 to vector<66x66xf32>
    %119 = arith.minimumf %118, %117 : vector<66x66xf32>
    %c0_45 = arith.constant 0 : index
    %c4_46 = arith.constant 4 : index
    %c0_47 = arith.constant 0 : index
    %c0_48 = arith.constant 0 : index
    %120 = vector.load %arg3[%c0_45, %c4_46, %c0_47, %c0_48] : memref<1x8x66x66xf32, #tpu.memory_space<vmem>>, vector<1x1x66x66xf32>
    %121 = vector.shape_cast %120 : vector<1x1x66x66xf32> to vector<66x66xf32>
    %122 = vector.shape_cast %119 : vector<66x66xf32> to vector<1x1x66x66xf32>
    tpu.vector_store %arg3[%c0_45, %c4_46, %c0_47, %c0_48], %122 {strides = array<i32>} : memref<1x8x66x66xf32, #tpu.memory_space<vmem>>, vector<1x1x66x66xf32>,
    %123 = vector.broadcast %15 : f32 to vector<66x66xf32>
    %124 = arith.mulf %123, %33 : vector<66x66xf32>
    %125 = vector.broadcast %29 : f32 to vector<66x66xf32>
    %126 = arith.addf %125, %124 : vector<66x66xf32>
    %127 = vector.broadcast %16 : f32 to vector<66x66xf32>
    %128 = arith.mulf %127, %35 : vector<66x66xf32>
    %129 = arith.addf %126, %128 : vector<66x66xf32>
    %130 = vector.broadcast %17 : f32 to vector<66x66xf32>
    %131 = arith.mulf %130, %37 : vector<66x66xf32>
    %132 = arith.addf %129, %131 : vector<66x66xf32>
    %cst_49 = arith.constant 0.000000e+00 : f32
    %cst_50 = arith.constant 1.000000e+00 : f32
    %133 = vector.broadcast %cst_49 : f32 to vector<66x66xf32>
    %134 = arith.maximumf %133, %132 : vector<66x66xf32>
    %135 = vector.broadcast %cst_50 : f32 to vector<66x66xf32>
    %136 = arith.minimumf %135, %134 : vector<66x66xf32>
    %c0_51 = arith.constant 0 : index
    %c5_52 = arith.constant 5 : index
    %c0_53 = arith.constant 0 : index
    %c0_54 = arith.constant 0 : index
    %137 = vector.load %arg3[%c0_51, %c5_52, %c0_53, %c0_54] : memref<1x8x66x66xf32, #tpu.memory_space<vmem>>, vector<1x1x66x66xf32>
    %138 = vector.shape_cast %137 : vector<1x1x66x66xf32> to vector<66x66xf32>
    %139 = vector.shape_cast %136 : vector<66x66xf32> to vector<1x1x66x66xf32>
    tpu.vector_store %arg3[%c0_51, %c5_52, %c0_53, %c0_54], %139 {strides = array<i32>} : memref<1x8x66x66xf32, #tpu.memory_space<vmem>>, vector<1x1x66x66xf32>,
    %140 = vector.broadcast %18 : f32 to vector<66x66xf32>
    %141 = arith.mulf %140, %33 : vector<66x66xf32>
    %142 = vector.broadcast %30 : f32 to vector<66x66xf32>
    %143 = arith.addf %142, %141 : vector<66x66xf32>
    %144 = vector.broadcast %19 : f32 to vector<66x66xf32>
    %145 = arith.mulf %144, %35 : vector<66x66xf32>
    %146 = arith.addf %143, %145 : vector<66x66xf32>
    %147 = vector.broadcast %20 : f32 to vector<66x66xf32>
    %148 = arith.mulf %147, %37 : vector<66x66xf32>
    %149 = arith.addf %146, %148 : vector<66x66xf32>
    %cst_55 = arith.constant 0.000000e+00 : f32
    %cst_56 = arith.constant 1.000000e+00 : f32
    %150 = vector.broadcast %cst_55 : f32 to vector<66x66xf32>
    %151 = arith.maximumf %150, %149 : vector<66x66xf32>
    %152 = vector.broadcast %cst_56 : f32 to vector<66x66xf32>
    %153 = arith.minimumf %152, %151 : vector<66x66xf32>
    %c0_57 = arith.constant 0 : index
    %c6_58 = arith.constant 6 : index
    %c0_59 = arith.constant 0 : index
    %c0_60 = arith.constant 0 : index
    %154 = vector.load %arg3[%c0_57, %c6_58, %c0_59, %c0_60] : memref<1x8x66x66xf32, #tpu.memory_space<vmem>>, vector<1x1x66x66xf32>
    %155 = vector.shape_cast %154 : vector<1x1x66x66xf32> to vector<66x66xf32>
    %156 = vector.shape_cast %153 : vector<66x66xf32> to vector<1x1x66x66xf32>
    tpu.vector_store %arg3[%c0_57, %c6_58, %c0_59, %c0_60], %156 {strides = array<i32>} : memref<1x8x66x66xf32, #tpu.memory_space<vmem>>, vector<1x1x66x66xf32>,
    %157 = vector.broadcast %21 : f32 to vector<66x66xf32>
    %158 = arith.mulf %157, %33 : vector<66x66xf32>
    %159 = vector.broadcast %31 : f32 to vector<66x66xf32>
    %160 = arith.addf %159, %158 : vector<66x66xf32>
    %161 = vector.broadcast %22 : f32 to vector<66x66xf32>
    %162 = arith.mulf %161, %35 : vector<66x66xf32>
    %163 = arith.addf %160, %162 : vector<66x66xf32>
    %164 = vector.broadcast %23 : f32 to vector<66x66xf32>
    %165 = arith.mulf %164, %37 : vector<66x66xf32>
    %166 = arith.addf %163, %165 : vector<66x66xf32>
    %cst_61 = arith.constant 0.000000e+00 : f32
    %cst_62 = arith.constant 1.000000e+00 : f32
    %167 = vector.broadcast %cst_61 : f32 to vector<66x66xf32>
    %168 = arith.maximumf %167, %166 : vector<66x66xf32>
    %169 = vector.broadcast %cst_62 : f32 to vector<66x66xf32>
    %170 = arith.minimumf %169, %168 : vector<66x66xf32>
    %c0_63 = arith.constant 0 : index
    %c7_64 = arith.constant 7 : index
    %c0_65 = arith.constant 0 : index
    %c0_66 = arith.constant 0 : index
    %171 = vector.load %arg3[%c0_63, %c7_64, %c0_65, %c0_66] : memref<1x8x66x66xf32, #tpu.memory_space<vmem>>, vector<1x1x66x66xf32>
    %172 = vector.shape_cast %171 : vector<1x1x66x66xf32> to vector<66x66xf32>
    %173 = vector.shape_cast %170 : vector<66x66xf32> to vector<1x1x66x66xf32>
    tpu.vector_store %arg3[%c0_63, %c7_64, %c0_65, %c0_66], %173 {strides = array<i32>} : memref<1x8x66x66xf32, #tpu.memory_space<vmem>>, vector<1x1x66x66xf32>,
    return
  }
}

</mosaic_0001>

<bundles_post_ra>
// kernel: tpu_custom_call.1
= control target key start
LH: loop header
LB: loop body
LE: loop exit
PB: predicated region body
PF: predicated region fallthrough
CT: control target
= control target key end

     0   :  { %8 = vsyncpa [#allocation3], 0  ;;  %s2201_s0 = inlined_call_operand.vmem [shape: f32[24], index: 0, kind: input, shape index: {}]   ;;  %s2202_s1 = inlined_call_operand.vmem [shape: f32[8], index: 1, kind: input, shape index: {}]   ;;  %s2203_s2 = inlined_call_operand.vmem [shape: f32[1,3,66,66], index: 2, kind: input, shape index: {}]   ;;  %s2204_s3 = inlined_call_operand.vmem [shape: f32[1,8,66,66], index: 3, kind: output, shape index: {}]  }
   0x1   :  { %s16_s14 = sshll.u32 %s2201_s0, 4  ;;  %s17_s14 = int_to_ptr.vmem [resolvable:$true] %s16_s14 }
   0x2   :  { %9 = vsyncpa [#allocation5], 0  ;;  %s26_s17 = sshll.u32 %s2202_s1, 4  ;;  %s935_s18 = scalar_lea.vmem %s17_s14, 16  ;;  %s27_s17 = int_to_ptr.vmem [resolvable:$true] %s26_s17 }
   0x3   :  { %p936_p0 = scmp.ne.s32.totalorder %s17_s14, %s935_s18  ;;  %p940_p1 = scmp.lt.s32.totalorder %s17_s14, %s17_s14 }
   0x4   :  { %p941_p2 = scmp.lt.s32.totalorder %s935_s18, %s935_s18 }
   0x6   :  { %p942_p3 = por %p941_p2, %p940_p1 }
   0x8   :  { %p943_p4 = pnand %p942_p3, %p936_p0 }
   0xa   :  { %946 = shalt.err (!%p943_p4)
}
   0xb   :  { %s963_s19 = smov [#allocation2]   ;;  %s947_s20 = scalar_lea.vmem %s27_s17, 16 }
   0xc   :  { %19 = dma.vmem_to_smem %s17_s14, 16, %s963_s19, [#allocation3]  }
   0xd   :  { %p948_p5 = scmp.ne.s32.totalorder %s27_s17, %s947_s20  ;;  %p952_p6 = scmp.lt.s32.totalorder %s27_s17, %s27_s17 }
   0xe   :  { %p953_p7 = scmp.lt.s32.totalorder %s947_s20, %s947_s20 }
  0x10   :  { %p954_p8 = por %p953_p7, %p952_p6 }
  0x12   :  { %p955_p9 = pnand %p954_p8, %p948_p5 }
  0x14   :  { %958 = shalt.err (!%p955_p9)
}
  0x15   :  { %s964_s0 = smov [#allocation4]  }
  0x16   :  { %29 = dma.vmem_to_smem %s27_s17, 16, %s964_s0, [#allocation5]  }
  0x17   :  { %959 = dma.done.wait [#allocation3], 16  }
  0x18   :  { %960 = vsyncadd [#allocation3], 4294967280 }
  0x19   :  { %961 = dma.done.wait [#allocation5], 16  }
  0x1a   :  { %962 = vsyncadd [#allocation5], 4294967280 }
  0x1b   :  { %38 = sfence }
  0x1c   :  { %s39_s1 = sld [smem:[#allocation2]]  ;;  %s795_s21 = sld [smem:[#allocation2 + $0x1]]  ;;  %v994_v0 = vld [vmem:[%s2203_s2] sm:$0xff]  ;;  %v999_v1 = vld [vmem:[%s2203_s2 + $0x48] sm:$0xff]  ;;  %v1004_v2 = vld [vmem:[%s2203_s2 + $0x90] sm:$0xff]  ;;  %vm176_vm0 = vcmask 539648  }
  0x1d   :  { %s796_s22 = sld [smem:[#allocation2 + $0x2]]  ;;  %s63_s23 = sld [smem:[#allocation4]]  ;;  %v1009_v3 = vld [vmem:[%s2203_s2 + $0x8] sm:$0xff]  ;;  %v1014_v4 = vld [vmem:[%s2203_s2 + $0x50] sm:$0xff]  ;;  %v1019_v5 = vld [vmem:[%s2203_s2 + $0x98] sm:$0xff]  ;;  %vm185_vm1 = vcmask 533504  }
  0x1e   :  { %v1024_v6 = vld [vmem:[%s2203_s2 + $0x10] sm:$0xff]  ;;  %v1029_v7 = vld [vmem:[%s2203_s2 + $0x58] sm:$0xff]  ;;  %v1038_v10 = vld [vmem:[%s2203_s2 + $0xa0] sm:$0xff]  ;;  %s1141_s8 = sld [smem:[#allocation2 + $0x3]]  ;;  %s1150_s11 = sld [smem:[#allocation2 + $0x4]] }
  0x1f   :  { %v1043_v11 = vld [vmem:[%s2203_s2 + $0x18] sm:$0xff]  ;;  %v1056_v16 = vld [vmem:[%s2203_s2 + $0x60] sm:$0xff]  ;;  %v1061_v17 = vld [vmem:[%s2203_s2 + $0xa8] sm:$0xff]  ;;  %s1159_s14 = sld [smem:[#allocation2 + $0x5]]  ;;  %s1161_s15 = sld [smem:[#allocation4 + $0x1]] }
  0x20   :  { %v1074_v22 = vld [vmem:[%s2203_s2 + $0x20] sm:$0xff]  ;;  %v1079_v23 = vld [vmem:[%s2203_s2 + $0x68] sm:$0xff]  ;;  %v1091_v28 = vld [vmem:[%s2203_s2 + $0xb0] sm:$0xff]  ;;  %s1296_s16 = sld [smem:[#allocation4 + $0x2]]  ;;  %s1299_s17 = sld [smem:[#allocation2 + $0x7]] }
  0x21   :  { %v1096_v29 = vld [vmem:[%s2203_s2 + $0x28] sm:$0xff]  ;;  %v1108_v34 = vld [vmem:[%s2203_s2 + $0x70] sm:$0xff]  ;;  %v1118_v39 = vld [vmem:[%s2203_s2 + $0xb8] sm:$0xff]  ;;  %s1301_s18 = sld [smem:[#allocation2 + $0x8]]  ;;  %s1411_s9 = sld [smem:[#allocation2 + $0x9]] }
  0x22   :  { %v1031_v8 = vstv %s39_s1  ;;  %v1033_v9 = vstv %s795_s21  ;;  %v1128_v44 = vld [vmem:[%s2203_s2 + $0x30] sm:$0xff]  ;;  %v1136_v49 = vld [vmem:[%s2203_s2 + $0x78] sm:$0xff]  ;;  %s1426_s12 = sld [smem:[#allocation2 + $0xa]]  ;;  %s1428_s13 = sld [smem:[#allocation2 + $0xb]] }
  0x23   :  { %v101_v12 = vmul.f32 %v1031_v8, %v994_v0  ;;  %v1047_v13 = vstv %s63_s23  ;;  %v121_v14 = vmul.f32 %v999_v1, %v1033_v9  ;;  %v1051_v15 = vstv %s796_s22  ;;  %v1146_v57 = vld [vmem:[%s2203_s2 + $0xc0] sm:$0xff]  ;;  %v1157_v63 = vld [vmem:[%s2203_s2 + $0x38] sm:$0xff]  ;;  %s1528_s28 = sld [smem:[#allocation2 + $0xc]]  ;;  %s1534_s29 = sld [smem:[#allocation2 + $0xd]] }
  0x24   :  { %v140_v18 = vmul.f32 %v1004_v2, %v1051_v15  ;;  %v102_v19 = vmul.f32 %v1031_v8, %v1009_v3  ;;  %v122_v20 = vmul.f32 %v1014_v4, %v1033_v9  ;;  %v141_v21 = vmul.f32 %v1019_v5, %v1051_v15  ;;  %s1536_s30 = sld [smem:[#allocation4 + $0x4]]  ;;  %s1549_s6 = sld [smem:[#allocation2 + $0xe]] }
  0x25   :  { %v111_v24 = vadd.f32 %v1047_v13, %v101_v12  ;;  %v103_v25 = vmul.f32 %v1031_v8, %v1024_v6  ;;  %v123_v26 = vmul.f32 %v1029_v7, %v1033_v9  ;;  %v142_v27 = vmul.f32 %v1038_v10, %v1051_v15  ;;  %s1647_s21 = sld [smem:[#allocation2 + $0xf]]  ;;  %s1654_s22 = sld [smem:[#allocation4 + $0x5]] }
  0x26   :  { %v112_v30 = vadd.f32 %v1047_v13, %v102_v19  ;;  %v104_v31 = vmul.f32 %v1031_v8, %v1043_v11  ;;  %v124_v32 = vmul.f32 %v1056_v16, %v1033_v9  ;;  %v143_v33 = vmul.f32 %v1061_v17, %v1051_v15  ;;  %s1662_s25 = sld [smem:[#allocation2 + $0x10]]  ;;  %s1664_s26 = sld [smem:[#allocation2 + $0x11]] }
  0x27   :  { %v130_v35 = vadd.f32 %v121_v14, %v111_v24  ;;  %v113_v36 = vadd.f32 %v1047_v13, %v103_v25  ;;  %v105_v37 = vmul.f32 %v1031_v8, %v1074_v22  ;;  %v125_v38 = vmul.f32 %v1079_v23, %v1033_v9  ;;  %s1787_s0 = sld [smem:[#allocation2 + $0x14]]  ;;  %s1995_s1 = sld [smem:[#allocation2 + $0x16]] }
  0x28   :  { %v131_v40 = vadd.f32 %v122_v20, %v112_v30  ;;  %v114_v41 = vadd.f32 %v1047_v13, %v104_v31  ;;  %v144_v42 = vmul.f32 %v1091_v28, %v1051_v15  ;;  %v106_v43 = vmul.f32 %v1031_v8, %v1096_v29  ;;  %v1167_v20 = vld [vmem:[%s2203_s2 + $0x80] sm:$0xff] }
  0x29   :  { %v149_v45 = vadd.f32 %v140_v18, %v130_v35  ;;  %v132_v46 = vadd.f32 %v123_v26, %v113_v36  ;;  %v115_v47 = vadd.f32 %v1047_v13, %v105_v37  ;;  %v126_v48 = vmul.f32 %v1108_v34, %v1033_v9  ;;  %v1179_v30 = vld [vmem:[%s2203_s2 + $0x40] sm:$0x3]  ;;  %v1190_v36 = vld [vmem:[%s2203_s2 + $0x88] sm:$0x3]  ;;  %v1195_v37 = vld [vmem:[%s2203_s2 + $0xd0] sm:$0x3] }
  0x2a   :  { %v150_v50 = vadd.f32 %v141_v21, %v131_v40  ;;  %v133_v51 = vadd.f32 %v124_v32, %v114_v41  ;;  %v116_v52 = vadd.f32 %v1047_v13, %v106_v43  ;;  %v145_v53 = vmul.f32 %v1118_v39, %v1051_v15  ;;  %v1172_v21 = vld [vmem:[%s2203_s2 + $0xc8] sm:$0xff] }
  0x2b   :  { %v158_v54 = vmax.f32 %v149_v45, 0.0  ;;  %v151_v55 = vadd.f32 %v142_v27, %v132_v46  ;;  %v134_v56 = vadd.f32 %v125_v38, %v115_v47  ;;  %v107_v58 = vmul.f32 %v1031_v8, %v1128_v44 }
  0x2c   :  { %v159_v59 = vmax.f32 %v150_v50, 0.0  ;;  %v152_v60 = vadd.f32 %v143_v33, %v133_v51  ;;  %v135_v61 = vadd.f32 %v126_v48, %v116_v52  ;;  %v127_v62 = vmul.f32 %v1136_v49, %v1033_v9 }
  0x2d   :  { %v167_v12 = vmin.f32 %v158_v54, 1.0  ;;  %v160_v14 = vmax.f32 %v151_v55, 0.0  ;;  %v153_v18 = vadd.f32 %v144_v42, %v134_v56  ;;  %v117_v19 = vadd.f32 %v1047_v13, %v107_v58 }
  0x2e   :  { %v168_v24 = vmin.f32 %v159_v59, 1.0  ;;  %v161_v25 = vmax.f32 %v152_v60, 0.0  ;;  %v154_v26 = vadd.f32 %v145_v53, %v135_v61  ;;  %v146_v27 = vmul.f32 %v1146_v57, %v1051_v15 }
  0x2f   :  { %177 = vst.msk [vmem:[%s2204_s3] sm:$0xff] %vm176_vm0, %v167_v12  ;;  %v169_v31 = vmin.f32 %v160_v14, 1.0  ;;  %v162_v32 = vmax.f32 %v153_v18, 0.0  ;;  %v136_v33 = vadd.f32 %v127_v62, %v117_v19  ;;  %v108_v35 = vmul.f32 %v1031_v8, %v1157_v63 }
  0x30   :  { %178 = vst.msk [vmem:[%s2204_s3 + $0x8] sm:$0xff] %vm176_vm0, %v168_v24  ;;  %v170_v38 = vmin.f32 %v161_v25, 1.0  ;;  %v163_v40 = vmax.f32 %v154_v26, 0.0  ;;  %v128_v41 = vmul.f32 %v1167_v20, %v1033_v9  ;;  %v147_v42 = vmul.f32 %v1172_v21, %v1051_v15 }
  0x31   :  { %179 = vst.msk [vmem:[%s2204_s3 + $0x10] sm:$0xff] %vm176_vm0, %v169_v31  ;;  %v171_v43 = vmin.f32 %v162_v32, 1.0  ;;  %v155_v45 = vadd.f32 %v146_v27, %v136_v33  ;;  %v118_v46 = vadd.f32 %v1047_v13, %v108_v35  ;;  %v109_v47 = vmul.f32 %v1031_v8, %v1179_v30 }
  0x32   :  { %180 = vst.msk [vmem:[%s2204_s3 + $0x18] sm:$0xff] %vm176_vm0, %v170_v38  ;;  %v172_v48 = vmin.f32 %v163_v40, 1.0  ;;  %v129_v50 = vmul.f32 %v1190_v36, %v1033_v9  ;;  %v148_v51 = vmul.f32 %v1195_v37, %v1051_v15  ;;  %v1221_v52 = vstv %s1141_s8  ;;  %s1416_s8 = sld [smem:[#allocation4 + $0x3]] }
  0x33   :  { %181 = vst.msk [vmem:[%s2204_s3 + $0x20] sm:$0xff] %vm176_vm0, %v171_v43  ;;  %v164_v8 = vmax.f32 %v155_v45, 0.0  ;;  %v137_v53 = vadd.f32 %v128_v41, %v118_v46  ;;  %v119_v54 = vadd.f32 %v1047_v13, %v109_v47  ;;  %v188_v55 = vmul.f32 %v1221_v52, %v994_v0 }
  0x34   :  { %182 = vst.msk [vmem:[%s2204_s3 + $0x28] sm:$0xff] %vm176_vm0, %v172_v48  ;;  %v1235_v9 = vstv %s1161_s15  ;;  %v1238_v15 = vstv %s1150_s11  ;;  %v1241_v56 = vstv %s1159_s14  ;;  %v189_v58 = vmul.f32 %v1221_v52, %v1009_v3  ;;  %s1290_s15 = sld [smem:[#allocation2 + $0x6]] }
  0x35   :  { %v173_v59 = vmin.f32 %v164_v8, 1.0  ;;  %v156_v60 = vadd.f32 %v147_v42, %v137_v53  ;;  %v138_v13 = vadd.f32 %v129_v50, %v119_v54  ;;  %v198_v61 = vadd.f32 %v1235_v9, %v188_v55 }
  0x36   :  { %v208_v62 = vmul.f32 %v999_v1, %v1238_v15  ;;  %v227_v12 = vmul.f32 %v1004_v2, %v1241_v56  ;;  %v199_v14 = vadd.f32 %v1235_v9, %v189_v58  ;;  %v209_v18 = vmul.f32 %v1014_v4, %v1238_v15 }
  0x37   :  { %183 = vst.msk [vmem:[%s2204_s3 + $0x30] sm:$0xff] %vm176_vm0, %v173_v59  ;;  %v165_v19 = vmax.f32 %v156_v60, 0.0  ;;  %v157_v24 = vadd.f32 %v148_v51, %v138_v13  ;;  %v228_v25 = vmul.f32 %v1019_v5, %v1241_v56  ;;  %v190_v26 = vmul.f32 %v1221_v52, %v1024_v6 }
  0x38   :  { %v217_v27 = vadd.f32 %v208_v62, %v198_v61  ;;  %v218_v31 = vadd.f32 %v209_v18, %v199_v14  ;;  %v210_v32 = vmul.f32 %v1029_v7, %v1238_v15  ;;  %v229_v33 = vmul.f32 %v1038_v10, %v1241_v56 }
  0x39   :  { %v174_v35 = vmin.f32 %v165_v19, 1.0  ;;  %v166_v38 = vmax.f32 %v157_v24, 0.0  ;;  %v200_v40 = vadd.f32 %v1235_v9, %v190_v26  ;;  %v191_v41 = vmul.f32 %v1221_v52, %v1043_v11 }
  0x3a   :  { %v236_v42 = vadd.f32 %v227_v12, %v217_v27  ;;  %v237_v43 = vadd.f32 %v228_v25, %v218_v31  ;;  %v211_v45 = vmul.f32 %v1056_v16, %v1238_v15  ;;  %v230_v46 = vmul.f32 %v1061_v17, %v1241_v56 }
  0x3b   :  { %184 = vst.msk [vmem:[%s2204_s3 + $0x38] sm:$0xff] %vm176_vm0, %v174_v35  ;;  %v175_v47 = vmin.f32 %v166_v38, 1.0  ;;  %v219_v48 = vadd.f32 %v210_v32, %v200_v40  ;;  %v201_v50 = vadd.f32 %v1235_v9, %v191_v41  ;;  %v192_v51 = vmul.f32 %v1221_v52, %v1074_v22 }
  0x3c   :  { %v245_v8 = vmax.f32 %v236_v42, 0.0  ;;  %v246_v53 = vmax.f32 %v237_v43, 0.0  ;;  %v212_v54 = vmul.f32 %v1079_v23, %v1238_v15  ;;  %v231_v55 = vmul.f32 %v1091_v28, %v1241_v56 }
  0x3d   :  { %186 = vst.msk [vmem:[%s2204_s3 + $0x40] sm:$0x3] %vm185_vm1, %v175_v47  ;;  %v238_v58 = vadd.f32 %v229_v33, %v219_v48  ;;  %v220_v59 = vadd.f32 %v211_v45, %v201_v50  ;;  %v202_v60 = vadd.f32 %v1235_v9, %v192_v51  ;;  %v193_v13 = vmul.f32 %v1221_v52, %v1096_v29 }
  0x3e   :  { %v254_v61 = vmin.f32 %v245_v8, 1.0  ;;  %v255_v62 = vmin.f32 %v246_v53, 1.0  ;;  %v213_v12 = vmul.f32 %v1108_v34, %v1238_v15  ;;  %v232_v14 = vmul.f32 %v1118_v39, %v1241_v56 }
  0x3f   :  { %v247_v18 = vmax.f32 %v238_v58, 0.0  ;;  %v239_v19 = vadd.f32 %v230_v46, %v220_v59  ;;  %v221_v24 = vadd.f32 %v212_v54, %v202_v60  ;;  %v203_v25 = vadd.f32 %v1235_v9, %v193_v13 }
  0x40   :  { %843 = vst.msk [vmem:[%s2204_s3 + $0x48] sm:$0xff] %vm176_vm0, %v254_v61  ;;  %844 = vst.msk [vmem:[%s2204_s3 + $0x50] sm:$0xff] %vm176_vm0, %v255_v62  ;;  %v194_v26 = vmul.f32 %v1221_v52, %v1128_v44  ;;  %v214_v27 = vmul.f32 %v1136_v49, %v1238_v15  ;;  %v233_v31 = vmul.f32 %v1146_v57, %v1241_v56 }
  0x41   :  { %v195_v32 = vmul.f32 %v1221_v52, %v1157_v63  ;;  %v256_v33 = vmin.f32 %v247_v18, 1.0  ;;  %v248_v35 = vmax.f32 %v239_v19, 0.0  ;;  %v240_v38 = vadd.f32 %v231_v55, %v221_v24 }
  0x42   :  { %v222_v40 = vadd.f32 %v213_v12, %v203_v25  ;;  %v204_v41 = vadd.f32 %v1235_v9, %v194_v26  ;;  %v215_v43 = vmul.f32 %v1167_v20, %v1238_v15  ;;  %v234_v45 = vmul.f32 %v1172_v21, %v1241_v56 }
  0x43   :  { %v205_v42 = vadd.f32 %v1235_v9, %v195_v32  ;;  %845 = vst.msk [vmem:[%s2204_s3 + $0x58] sm:$0xff] %vm176_vm0, %v256_v33  ;;  %v257_v46 = vmin.f32 %v248_v35, 1.0  ;;  %v249_v47 = vmax.f32 %v240_v38, 0.0  ;;  %v196_v50 = vmul.f32 %v1221_v52, %v1179_v30 }
  0x44   :  { %v241_v48 = vadd.f32 %v232_v14, %v222_v40  ;;  %v223_v51 = vadd.f32 %v214_v27, %v204_v41  ;;  %v216_v53 = vmul.f32 %v1190_v36, %v1238_v15  ;;  %v235_v54 = vmul.f32 %v1195_v37, %v1241_v56 }
  0x45   :  { %v224_v8 = vadd.f32 %v215_v43, %v205_v42  ;;  %846 = vst.msk [vmem:[%s2204_s3 + $0x60] sm:$0xff] %vm176_vm0, %v257_v46  ;;  %v258_v55 = vmin.f32 %v249_v47, 1.0  ;;  %v206_v59 = vadd.f32 %v1235_v9, %v196_v50  ;;  %v1341_v52 = vstv %s1290_s15 }
  0x46   :  { %v250_v58 = vmax.f32 %v241_v48, 0.0  ;;  %v242_v60 = vadd.f32 %v233_v31, %v223_v51  ;;  %v274_v61 = vmul.f32 %v1341_v52, %v994_v0  ;;  %v1346_v15 = vstv %s1296_s16  ;;  %s1766_s16 = sld [smem:[#allocation2 + $0x12]] }
  0x47   :  { %v243_v13 = vadd.f32 %v234_v45, %v224_v8  ;;  %847 = vst.msk [vmem:[%s2204_s3 + $0x68] sm:$0xff] %vm176_vm0, %v258_v55  ;;  %v225_v62 = vadd.f32 %v216_v53, %v206_v59  ;;  %v1353_v12 = vstv %s1299_s17  ;;  %v1356_v14 = vstv %s1301_s18  ;;  %s1772_s17 = sld [smem:[#allocation2 + $0x13]]  ;;  %s1774_s18 = sld [smem:[#allocation4 + $0x6]] }
  0x48   :  { %v259_v56 = vmin.f32 %v250_v58, 1.0  ;;  %v251_v9 = vmax.f32 %v242_v60, 0.0  ;;  %v284_v19 = vadd.f32 %v1346_v15, %v274_v61  ;;  %v294_v24 = vmul.f32 %v999_v1, %v1353_v12 }
  0x49   :  { %v252_v18 = vmax.f32 %v243_v13, 0.0  ;;  %v244_v25 = vadd.f32 %v235_v54, %v225_v62  ;;  %v313_v26 = vmul.f32 %v1004_v2, %v1356_v14  ;;  %v275_v27 = vmul.f32 %v1341_v52, %v1009_v3 }
  0x4a   :  { %848 = vst.msk [vmem:[%s2204_s3 + $0x70] sm:$0xff] %vm176_vm0, %v259_v56  ;;  %v295_v31 = vmul.f32 %v1014_v4, %v1353_v12  ;;  %v260_v32 = vmin.f32 %v251_v9, 1.0  ;;  %v303_v35 = vadd.f32 %v294_v24, %v284_v19  ;;  %v314_v38 = vmul.f32 %v1019_v5, %v1356_v14 }
  0x4b   :  { %v261_v33 = vmin.f32 %v252_v18, 1.0  ;;  %v253_v40 = vmax.f32 %v244_v25, 0.0  ;;  %v285_v41 = vadd.f32 %v1346_v15, %v275_v27  ;;  %v276_v42 = vmul.f32 %v1341_v52, %v1024_v6 }
  0x4c   :  { %v296_v43 = vmul.f32 %v1029_v7, %v1353_v12  ;;  %849 = vst.msk [vmem:[%s2204_s3 + $0x78] sm:$0xff] %vm176_vm0, %v260_v32  ;;  %v322_v45 = vadd.f32 %v313_v26, %v303_v35  ;;  %v315_v46 = vmul.f32 %v1038_v10, %v1356_v14  ;;  %v277_v47 = vmul.f32 %v1341_v52, %v1043_v11 }
  0x4d   :  { %850 = vst.msk [vmem:[%s2204_s3 + $0x80] sm:$0xff] %vm176_vm0, %v261_v33  ;;  %v297_v48 = vmul.f32 %v1056_v16, %v1353_v12  ;;  %v262_v50 = vmin.f32 %v253_v40, 1.0  ;;  %v304_v51 = vadd.f32 %v295_v31, %v285_v41  ;;  %v286_v8 = vadd.f32 %v1346_v15, %v276_v42 }
  0x4e   :  { %v316_v53 = vmul.f32 %v1061_v17, %v1356_v14  ;;  %v331_v54 = vmax.f32 %v322_v45, 0.0  ;;  %v287_v55 = vadd.f32 %v1346_v15, %v277_v47  ;;  %v278_v58 = vmul.f32 %v1341_v52, %v1074_v22 }
  0x4f   :  { %v298_v59 = vmul.f32 %v1079_v23, %v1353_v12  ;;  %851 = vst.msk [vmem:[%s2204_s3 + $0x88] sm:$0x3] %vm185_vm1, %v262_v50  ;;  %v323_v60 = vadd.f32 %v314_v38, %v304_v51  ;;  %v305_v13 = vadd.f32 %v296_v43, %v286_v8  ;;  %v317_v61 = vmul.f32 %v1091_v28, %v1356_v14 }
  0x50   :  { %v279_v56 = vmul.f32 %v1341_v52, %v1096_v29  ;;  %v340_v62 = vmin.f32 %v331_v54, 1.0  ;;  %v306_v9 = vadd.f32 %v297_v48, %v287_v55  ;;  %v288_v18 = vadd.f32 %v1346_v15, %v278_v58 }
  0x51   :  { %v299_v19 = vmul.f32 %v1108_v34, %v1353_v12  ;;  %v332_v24 = vmax.f32 %v323_v60, 0.0  ;;  %v324_v25 = vadd.f32 %v315_v46, %v305_v13  ;;  %v318_v27 = vmul.f32 %v1118_v39, %v1356_v14 }
  0x52   :  { %v289_v26 = vadd.f32 %v1346_v15, %v279_v56  ;;  %852 = vst.msk [vmem:[%s2204_s3 + $0x90] sm:$0xff] %vm176_vm0, %v340_v62  ;;  %v325_v31 = vadd.f32 %v316_v53, %v306_v9  ;;  %v307_v32 = vadd.f32 %v298_v59, %v288_v18  ;;  %v280_v33 = vmul.f32 %v1341_v52, %v1128_v44 }
  0x53   :  { %v300_v35 = vmul.f32 %v1136_v49, %v1353_v12  ;;  %v341_v38 = vmin.f32 %v332_v24, 1.0  ;;  %v333_v40 = vmax.f32 %v324_v25, 0.0  ;;  %v319_v42 = vmul.f32 %v1146_v57, %v1356_v14 }
  0x54   :  { %v308_v41 = vadd.f32 %v299_v19, %v289_v26  ;;  %v334_v43 = vmax.f32 %v325_v31, 0.0  ;;  %v326_v45 = vadd.f32 %v317_v61, %v307_v32  ;;  %v290_v46 = vadd.f32 %v1346_v15, %v280_v33 }
  0x55   :  { %v281_v47 = vmul.f32 %v1341_v52, %v1157_v63  ;;  %853 = vst.msk [vmem:[%s2204_s3 + $0x98] sm:$0xff] %vm176_vm0, %v341_v38  ;;  %v342_v48 = vmin.f32 %v333_v40, 1.0  ;;  %v301_v51 = vmul.f32 %v1167_v20, %v1353_v12  ;;  %v320_v8 = vmul.f32 %v1172_v21, %v1356_v14 }
  0x56   :  { %v327_v50 = vadd.f32 %v318_v27, %v308_v41  ;;  %v343_v53 = vmin.f32 %v334_v43, 1.0  ;;  %v335_v54 = vmax.f32 %v326_v45, 0.0  ;;  %v309_v55 = vadd.f32 %v300_v35, %v290_v46 }
  0x57   :  { %v291_v58 = vadd.f32 %v1346_v15, %v281_v47  ;;  %854 = vst.msk [vmem:[%s2204_s3 + $0xa0] sm:$0xff] %vm176_vm0, %v342_v48  ;;  %v282_v60 = vmul.f32 %v1341_v52, %v1179_v30  ;;  %v302_v13 = vmul.f32 %v1190_v36, %v1353_v12  ;;  %v321_v61 = vmul.f32 %v1195_v37, %v1356_v14 }
  0x58   :  { %v336_v59 = vmax.f32 %v327_v50, 0.0  ;;  %855 = vst.msk [vmem:[%s2204_s3 + $0xa8] sm:$0xff] %vm176_vm0, %v343_v53  ;;  %v344_v56 = vmin.f32 %v335_v54, 1.0  ;;  %v328_v62 = vadd.f32 %v319_v42, %v309_v55  ;;  %v1459_v18 = vstv %s1411_s9 }
  0x59   :  { %v310_v9 = vadd.f32 %v301_v51, %v291_v58  ;;  %v292_v52 = vadd.f32 %v1346_v15, %v282_v60  ;;  %v360_v24 = vmul.f32 %v1459_v18, %v994_v0  ;;  %v1465_v12 = vstv %s1416_s8 }
  0x5a   :  { %v345_v19 = vmin.f32 %v336_v59, 1.0  ;;  %856 = vst.msk [vmem:[%s2204_s3 + $0xb0] sm:$0xff] %vm176_vm0, %v344_v56  ;;  %v337_v14 = vmax.f32 %v328_v62, 0.0  ;;  %v1472_v26 = vstv %s1426_s12  ;;  %v1475_v27 = vstv %s1428_s13  ;;  %s1965_s12 = sld [smem:[#allocation2 + $0x15]] }
  0x5b   :  { %v329_v25 = vadd.f32 %v320_v8, %v310_v9  ;;  %v311_v15 = vadd.f32 %v302_v13, %v292_v52  ;;  %v370_v31 = vadd.f32 %v1465_v12, %v360_v24  ;;  %v380_v32 = vmul.f32 %v999_v1, %v1472_v26 }
  0x5c   :  { %857 = vst.msk [vmem:[%s2204_s3 + $0xb8] sm:$0xff] %vm176_vm0, %v345_v19  ;;  %v399_v33 = vmul.f32 %v1004_v2, %v1475_v27  ;;  %v346_v35 = vmin.f32 %v337_v14, 1.0  ;;  %v361_v40 = vmul.f32 %v1459_v18, %v1009_v3  ;;  %v381_v41 = vmul.f32 %v1014_v4, %v1472_v26 }
  0x5d   :  { %v338_v38 = vmax.f32 %v329_v25, 0.0  ;;  %v330_v42 = vadd.f32 %v321_v61, %v311_v15  ;;  %v389_v43 = vadd.f32 %v380_v32, %v370_v31  ;;  %v400_v45 = vmul.f32 %v1019_v5, %v1475_v27 }
  0x5e   :  { %v362_v46 = vmul.f32 %v1459_v18, %v1024_v6  ;;  %858 = vst.msk [vmem:[%s2204_s3 + $0xc0] sm:$0xff] %vm176_vm0, %v346_v35  ;;  %v371_v48 = vadd.f32 %v1465_v12, %v361_v40  ;;  %v382_v50 = vmul.f32 %v1029_v7, %v1472_v26  ;;  %v401_v51 = vmul.f32 %v1038_v10, %v1475_v27 }
  0x5f   :  { %v347_v47 = vmin.f32 %v338_v38, 1.0  ;;  %v339_v8 = vmax.f32 %v330_v42, 0.0  ;;  %v408_v53 = vadd.f32 %v399_v33, %v389_v43  ;;  %v363_v55 = vmul.f32 %v1459_v18, %v1043_v11 }
  0x60   :  { %v372_v54 = vadd.f32 %v1465_v12, %v362_v46  ;;  %v390_v58 = vadd.f32 %v381_v41, %v371_v48  ;;  %v383_v59 = vmul.f32 %v1056_v16, %v1472_v26  ;;  %v402_v60 = vmul.f32 %v1061_v17, %v1475_v27 }
  0x61   :  { %859 = vst.msk [vmem:[%s2204_s3 + $0xc8] sm:$0xff] %vm176_vm0, %v347_v47  ;;  %v364_v13 = vmul.f32 %v1459_v18, %v1074_v22  ;;  %v348_v61 = vmin.f32 %v339_v8, 1.0  ;;  %v417_v56 = vmax.f32 %v408_v53, 0.0  ;;  %v373_v9 = vadd.f32 %v1465_v12, %v363_v55 }
  0x62   :  { %v391_v62 = vadd.f32 %v382_v50, %v372_v54  ;;  %v409_v19 = vadd.f32 %v400_v45, %v390_v58  ;;  %v384_v24 = vmul.f32 %v1079_v23, %v1472_v26  ;;  %v403_v14 = vmul.f32 %v1091_v28, %v1475_v27 }
  0x63   :  { %v374_v52 = vadd.f32 %v1465_v12, %v364_v13  ;;  %860 = vst.msk [vmem:[%s2204_s3 + $0xd0] sm:$0x3] %vm185_vm1, %v348_v61  ;;  %v426_v25 = vmin.f32 %v417_v56, 1.0  ;;  %v392_v31 = vadd.f32 %v383_v59, %v373_v9  ;;  %v365_v32 = vmul.f32 %v1459_v18, %v1096_v29 }
  0x64   :  { %v410_v15 = vadd.f32 %v401_v51, %v391_v62  ;;  %v418_v33 = vmax.f32 %v409_v19, 0.0  ;;  %v385_v38 = vmul.f32 %v1108_v34, %v1472_v26  ;;  %v404_v40 = vmul.f32 %v1118_v39, %v1475_v27 }
  0x65   :  { %v393_v35 = vadd.f32 %v384_v24, %v374_v52  ;;  %861 = vst.msk [vmem:[%s2204_s3 + $0xd8] sm:$0xff] %vm176_vm0, %v426_v25  ;;  %v411_v42 = vadd.f32 %v402_v60, %v392_v31  ;;  %v375_v43 = vadd.f32 %v1465_v12, %v365_v32  ;;  %v366_v45 = vmul.f32 %v1459_v18, %v1128_v44 }
  0x66   :  { %v419_v41 = vmax.f32 %v410_v15, 0.0  ;;  %v427_v46 = vmin.f32 %v418_v33, 1.0  ;;  %v386_v48 = vmul.f32 %v1136_v49, %v1472_v26  ;;  %v405_v50 = vmul.f32 %v1146_v57, %v1475_v27 }
  0x67   :  { %v412_v47 = vadd.f32 %v403_v14, %v393_v35  ;;  %v420_v8 = vmax.f32 %v411_v42, 0.0  ;;  %v394_v53 = vadd.f32 %v385_v38, %v375_v43  ;;  %v376_v54 = vadd.f32 %v1465_v12, %v366_v45 }
  0x68   :  { %v428_v51 = vmin.f32 %v419_v41, 1.0  ;;  %862 = vst.msk [vmem:[%s2204_s3 + $0xe0] sm:$0xff] %vm176_vm0, %v427_v46  ;;  %v367_v58 = vmul.f32 %v1459_v18, %v1157_v63  ;;  %v387_v59 = vmul.f32 %v1167_v20, %v1472_v26  ;;  %v406_v60 = vmul.f32 %v1172_v21, %v1475_v27 }
  0x69   :  { %v421_v55 = vmax.f32 %v412_v47, 0.0  ;;  %v429_v13 = vmin.f32 %v420_v8, 1.0  ;;  %v413_v61 = vadd.f32 %v404_v40, %v394_v53  ;;  %v395_v56 = vadd.f32 %v386_v48, %v376_v54 }
  0x6a   :  { %863 = vst.msk [vmem:[%s2204_s3 + $0xe8] sm:$0xff] %vm176_vm0, %v428_v51  ;;  %v368_v62 = vmul.f32 %v1459_v18, %v1179_v30  ;;  %v377_v19 = vadd.f32 %v1465_v12, %v367_v58  ;;  %v388_v52 = vmul.f32 %v1190_v36, %v1472_v26  ;;  %v407_v24 = vmul.f32 %v1195_v37, %v1475_v27 }
  0x6b   :  { %v430_v9 = vmin.f32 %v421_v55, 1.0  ;;  %864 = vst.msk [vmem:[%s2204_s3 + $0xf0] sm:$0xff] %vm176_vm0, %v429_v13  ;;  %v422_v14 = vmax.f32 %v413_v61, 0.0  ;;  %v414_v25 = vadd.f32 %v405_v50, %v395_v56  ;;  %v1579_v18 = vstv %s1528_s28 }
  0x6c   :  { %v378_v15 = vadd.f32 %v1465_v12, %v368_v62  ;;  %v396_v26 = vadd.f32 %v387_v59, %v377_v19  ;;  %v446_v27 = vmul.f32 %v1579_v18, %v994_v0  ;;  %v1588_v31 = vstv %s1536_s30 }
  0x6d   :  { %865 = vst.msk [vmem:[%s2204_s3 + $0xf8] sm:$0xff] %vm176_vm0, %v430_v9  ;;  %v1591_v32 = vstv %s1534_s29  ;;  %v431_v33 = vmin.f32 %v422_v14, 1.0  ;;  %v423_v35 = vmax.f32 %v414_v25, 0.0  ;;  %v1597_v42 = vstv %s1549_s6 }
  0x6e   :  { %v397_v38 = vadd.f32 %v388_v52, %v378_v15  ;;  %v466_v12 = vmul.f32 %v999_v1, %v1591_v32  ;;  %v415_v40 = vadd.f32 %v406_v60, %v396_v26  ;;  %v456_v41 = vadd.f32 %v1588_v31, %v446_v27 }
  0x6f   :  { %v447_v43 = vmul.f32 %v1579_v18, %v1009_v3  ;;  %866 = vst.msk [vmem:[%s2204_s3 + $0x100] sm:$0xff] %vm176_vm0, %v431_v33  ;;  %v432_v45 = vmin.f32 %v423_v35, 1.0  ;;  %v485_v47 = vmul.f32 %v1004_v2, %v1597_v42  ;;  %v467_v48 = vmul.f32 %v1014_v4, %v1591_v32 }
  0x70   :  { %v416_v46 = vadd.f32 %v407_v24, %v397_v38  ;;  %v424_v50 = vmax.f32 %v415_v40, 0.0  ;;  %v475_v51 = vadd.f32 %v466_v12, %v456_v41  ;;  %v486_v53 = vmul.f32 %v1019_v5, %v1597_v42 }
  0x71   :  { %v457_v8 = vadd.f32 %v1588_v31, %v447_v43  ;;  %867 = vst.msk [vmem:[%s2204_s3 + $0x108] sm:$0xff] %vm176_vm0, %v432_v45  ;;  %v448_v55 = vmul.f32 %v1579_v18, %v1024_v6  ;;  %v468_v58 = vmul.f32 %v1029_v7, %v1591_v32  ;;  %v487_v59 = vmul.f32 %v1038_v10, %v1597_v42 }
  0x72   :  { %v425_v54 = vmax.f32 %v416_v46, 0.0  ;;  %v433_v60 = vmin.f32 %v424_v50, 1.0  ;;  %v494_v13 = vadd.f32 %v485_v47, %v475_v51  ;;  %v449_v56 = vmul.f32 %v1579_v18, %v1043_v11 }
  0x73   :  { %v476_v61 = vadd.f32 %v467_v48, %v457_v8  ;;  %v458_v9 = vadd.f32 %v1588_v31, %v448_v55  ;;  %v469_v19 = vmul.f32 %v1056_v16, %v1591_v32  ;;  %v488_v52 = vmul.f32 %v1061_v17, %v1597_v42 }
  0x74   :  { %v434_v62 = vmin.f32 %v425_v54, 1.0  ;;  %868 = vst.msk [vmem:[%s2204_s3 + $0x110] sm:$0xff] %vm176_vm0, %v433_v60  ;;  %v503_v24 = vmax.f32 %v494_v13, 0.0  ;;  %v459_v25 = vadd.f32 %v1588_v31, %v449_v56  ;;  %v450_v15 = vmul.f32 %v1579_v18, %v1074_v22 }
  0x75   :  { %v495_v14 = vadd.f32 %v486_v53, %v476_v61  ;;  %v477_v26 = vadd.f32 %v468_v58, %v458_v9  ;;  %v470_v27 = vmul.f32 %v1079_v23, %v1591_v32  ;;  %v489_v33 = vmul.f32 %v1091_v28, %v1597_v42 }
  0x76   :  { %869 = vst.msk [vmem:[%s2204_s3 + $0x118] sm:$0x3] %vm185_vm1, %v434_v62  ;;  %v451_v35 = vmul.f32 %v1579_v18, %v1096_v29  ;;  %v512_v38 = vmin.f32 %v503_v24, 1.0  ;;  %v478_v40 = vadd.f32 %v469_v19, %v459_v25  ;;  %v460_v41 = vadd.f32 %v1588_v31, %v450_v15 }
  0x77   :  { %v504_v12 = vmax.f32 %v495_v14, 0.0  ;;  %v496_v43 = vadd.f32 %v487_v59, %v477_v26  ;;  %v471_v46 = vmul.f32 %v1108_v34, %v1591_v32  ;;  %v490_v47 = vmul.f32 %v1118_v39, %v1597_v42 }
  0x78   :  { %v461_v45 = vadd.f32 %v1588_v31, %v451_v35  ;;  %870 = vst.msk [vmem:[%s2204_s3 + $0x120] sm:$0xff] %vm176_vm0, %v512_v38  ;;  %v497_v50 = vadd.f32 %v488_v52, %v478_v40  ;;  %v479_v51 = vadd.f32 %v470_v27, %v460_v41  ;;  %v452_v8 = vmul.f32 %v1579_v18, %v1128_v44 }
  0x79   :  { %v513_v48 = vmin.f32 %v504_v12, 1.0  ;;  %v505_v53 = vmax.f32 %v496_v43, 0.0  ;;  %v472_v55 = vmul.f32 %v1136_v49, %v1591_v32  ;;  %v491_v58 = vmul.f32 %v1146_v57, %v1597_v42 }
  0x7a   :  { %v480_v54 = vadd.f32 %v471_v46, %v461_v45  ;;  %v506_v59 = vmax.f32 %v497_v50, 0.0  ;;  %v498_v60 = vadd.f32 %v489_v33, %v479_v51  ;;  %v462_v13 = vadd.f32 %v1588_v31, %v452_v8 }
  0x7b   :  { %871 = vst.msk [vmem:[%s2204_s3 + $0x128] sm:$0xff] %vm176_vm0, %v513_v48  ;;  %v453_v61 = vmul.f32 %v1579_v18, %v1157_v63  ;;  %v514_v56 = vmin.f32 %v505_v53, 1.0  ;;  %v473_v9 = vmul.f32 %v1167_v20, %v1591_v32  ;;  %v492_v19 = vmul.f32 %v1172_v21, %v1597_v42 }
  0x7c   :  { %v499_v62 = vadd.f32 %v490_v47, %v480_v54  ;;  %v515_v52 = vmin.f32 %v506_v59, 1.0  ;;  %v507_v24 = vmax.f32 %v498_v60, 0.0  ;;  %v481_v14 = vadd.f32 %v472_v55, %v462_v13 }
  0x7d   :  { %v463_v25 = vadd.f32 %v1588_v31, %v453_v61  ;;  %872 = vst.msk [vmem:[%s2204_s3 + $0x130] sm:$0xff] %vm176_vm0, %v514_v56  ;;  %v454_v26 = vmul.f32 %v1579_v18, %v1179_v30  ;;  %v474_v27 = vmul.f32 %v1190_v36, %v1591_v32  ;;  %v493_v33 = vmul.f32 %v1195_v37, %v1597_v42 }
  0x7e   :  { %v508_v15 = vmax.f32 %v499_v62, 0.0  ;;  %873 = vst.msk [vmem:[%s2204_s3 + $0x138] sm:$0xff] %vm176_vm0, %v515_v52  ;;  %v516_v35 = vmin.f32 %v507_v24, 1.0  ;;  %v500_v38 = vadd.f32 %v491_v58, %v481_v14  ;;  %v1697_v40 = vstv %s1647_s21  ;;  %s1997_s21 = sld [smem:[#allocation2 + $0x17]] }
  0x7f   :  { %v482_v12 = vadd.f32 %v473_v9, %v463_v25  ;;  %v464_v18 = vadd.f32 %v1588_v31, %v454_v26  ;;  %v532_v43 = vmul.f32 %v1697_v40, %v994_v0  ;;  %v1703_v32 = vstv %s1654_s22 }
  0x80   :  { %v517_v41 = vmin.f32 %v508_v15, 1.0  ;;  %874 = vst.msk [vmem:[%s2204_s3 + $0x140] sm:$0xff] %vm176_vm0, %v516_v35  ;;  %v509_v42 = vmax.f32 %v500_v38, 0.0  ;;  %v1710_v46 = vstv %s1662_s25  ;;  %v1713_v47 = vstv %s1664_s26 }
  0x81   :  { %v501_v45 = vadd.f32 %v492_v19, %v482_v12  ;;  %v483_v31 = vadd.f32 %v474_v27, %v464_v18  ;;  %v542_v0 = vadd.f32 %v1703_v32, %v532_v43  ;;  %v552_v48 = vmul.f32 %v999_v1, %v1710_v46 }
  0x82   :  { %875 = vst.msk [vmem:[%s2204_s3 + $0x148] sm:$0xff] %vm176_vm0, %v517_v41  ;;  %v571_v50 = vmul.f32 %v1004_v2, %v1713_v47  ;;  %v518_v51 = vmin.f32 %v509_v42, 1.0  ;;  %v533_v53 = vmul.f32 %v1697_v40, %v1009_v3  ;;  %v553_v54 = vmul.f32 %v1014_v4, %v1710_v46 }
  0x83   :  { %v510_v8 = vmax.f32 %v501_v45, 0.0  ;;  %v502_v55 = vadd.f32 %v493_v33, %v483_v31  ;;  %v561_v58 = vadd.f32 %v552_v48, %v542_v0  ;;  %v572_v59 = vmul.f32 %v1019_v5, %v1713_v47 }
  0x84   :  { %v534_v60 = vmul.f32 %v1697_v40, %v1024_v6  ;;  %876 = vst.msk [vmem:[%s2204_s3 + $0x150] sm:$0xff] %vm176_vm0, %v518_v51  ;;  %v543_v2 = vadd.f32 %v1703_v32, %v533_v53  ;;  %v554_v3 = vmul.f32 %v1029_v7, %v1710_v46  ;;  %v573_v4 = vmul.f32 %v1038_v10, %v1713_v47 }
  0x85   :  { %v519_v1 = vmin.f32 %v510_v8, 1.0  ;;  %v511_v13 = vmax.f32 %v502_v55, 0.0  ;;  %v580_v61 = vadd.f32 %v571_v50, %v561_v58  ;;  %v535_v6 = vmul.f32 %v1697_v40, %v1043_v11 }
  0x86   :  { %v544_v5 = vadd.f32 %v1703_v32, %v534_v60  ;;  %v562_v56 = vadd.f32 %v553_v54, %v543_v2  ;;  %v555_v62 = vmul.f32 %v1056_v16, %v1710_v46  ;;  %v574_v7 = vmul.f32 %v1061_v17, %v1713_v47 }
  0x87   :  { %877 = vst.msk [vmem:[%s2204_s3 + $0x158] sm:$0xff] %vm176_vm0, %v519_v1  ;;  %v536_v10 = vmul.f32 %v1697_v40, %v1074_v22  ;;  %v520_v9 = vmin.f32 %v511_v13, 1.0  ;;  %v589_v19 = vmax.f32 %v580_v61, 0.0  ;;  %v545_v11 = vadd.f32 %v1703_v32, %v535_v6  ;;  %v1839_v1 = vld [vmem:[%s2203_s2 + $0x48] sm:$0xff] }
  0x88   :  { %v563_v52 = vadd.f32 %v554_v3, %v544_v5  ;;  %v581_v24 = vadd.f32 %v572_v59, %v562_v56  ;;  %v556_v25 = vmul.f32 %v1079_v23, %v1710_v46  ;;  %v575_v16 = vmul.f32 %v1091_v28, %v1713_v47  ;;  %v1850_v61 = vld [vmem:[%s2203_s2 + $0x8] sm:$0xff] }
  0x89   :  { %v546_v14 = vadd.f32 %v1703_v32, %v536_v10  ;;  %878 = vst.msk [vmem:[%s2204_s3 + $0x160] sm:$0x3] %vm185_vm1, %v520_v9  ;;  %v598_v17 = vmin.f32 %v589_v19, 1.0  ;;  %v564_v15 = vadd.f32 %v555_v62, %v545_v11  ;;  %v537_v26 = vmul.f32 %v1697_v40, %v1096_v29  ;;  %v1861_v62 = vld [vmem:[%s2203_s2 + $0x90] sm:$0xff] }
  0x8a   :  { %v582_v22 = vadd.f32 %v573_v4, %v563_v52  ;;  %v590_v27 = vmax.f32 %v581_v24, 0.0  ;;  %v557_v23 = vmul.f32 %v1108_v34, %v1710_v46  ;;  %v576_v28 = vmul.f32 %v1118_v39, %v1713_v47  ;;  %v1868_v10 = vld [vmem:[%s2203_s2 + $0x50] sm:$0xff]  ;;  %v1876_v24 = vld [vmem:[%s2203_s2 + $0x98] sm:$0xff] }
  0x8b   :  { %v565_v33 = vadd.f32 %v556_v25, %v546_v14  ;;  %879 = vst.msk [vmem:[%s2204_s3 + $0x168] sm:$0xff] %vm176_vm0, %v598_v17  ;;  %v583_v35 = vadd.f32 %v574_v7, %v564_v15  ;;  %v547_v38 = vadd.f32 %v1703_v32, %v537_v26  ;;  %v538_v12 = vmul.f32 %v1697_v40, %v1128_v44  ;;  %v1901_v26 = vld [vmem:[%s2203_s2 + $0xa0] sm:$0xff] }
  0x8c   :  { %v591_v29 = vmax.f32 %v582_v22, 0.0  ;;  %v599_v34 = vmin.f32 %v590_v27, 1.0  ;;  %v558_v39 = vmul.f32 %v1136_v49, %v1710_v46  ;;  %v577_v18 = vmul.f32 %v1146_v57, %v1713_v47  ;;  %v1894_v22 = vld [vmem:[%s2203_s2 + $0x58] sm:$0xff] }
  0x8d   :  { %v584_v41 = vadd.f32 %v575_v16, %v565_v33  ;;  %v592_v42 = vmax.f32 %v583_v35, 0.0  ;;  %v566_v45 = vadd.f32 %v557_v23, %v547_v38  ;;  %v548_v31 = vadd.f32 %v1703_v32, %v538_v12  ;;  %v1887_v16 = vld [vmem:[%s2203_s2 + $0x10] sm:$0xff] }
  0x8e   :  { %v600_v43 = vmin.f32 %v591_v29, 1.0  ;;  %880 = vst.msk [vmem:[%s2204_s3 + $0x170] sm:$0xff] %vm176_vm0, %v599_v34  ;;  %v539_v0 = vmul.f32 %v1697_v40, %v1157_v63  ;;  %v559_v49 = vmul.f32 %v1167_v20, %v1710_v46  ;;  %v578_v57 = vmul.f32 %v1172_v21, %v1713_v47  ;;  %v1908_v29 = vld [vmem:[%s2203_s2 + $0x18] sm:$0xff]  ;;  %v1916_v34 = vld [vmem:[%s2203_s2 + $0x60] sm:$0xff] }
  0x8f   :  { %v593_v44 = vmax.f32 %v584_v41, 0.0  ;;  %v601_v48 = vmin.f32 %v592_v42, 1.0  ;;  %v585_v50 = vadd.f32 %v576_v28, %v566_v45  ;;  %v567_v51 = vadd.f32 %v558_v39, %v548_v31  ;;  %v1923_v39 = vld [vmem:[%s2203_s2 + $0xa8] sm:$0xff]  ;;  %v1935_v31 = vld [vmem:[%s2203_s2 + $0x20] sm:$0xff] }
  0x90   :  { %881 = vst.msk [vmem:[%s2204_s3 + $0x178] sm:$0xff] %vm176_vm0, %v600_v43  ;;  %v540_v63 = vmul.f32 %v1697_v40, %v1179_v30  ;;  %v549_v53 = vadd.f32 %v1703_v32, %v539_v0  ;;  %v560_v20 = vmul.f32 %v1190_v36, %v1710_v46  ;;  %v579_v21 = vmul.f32 %v1195_v37, %v1713_v47  ;;  %v1826_v37 = vld [vmem:[%s2203_s2] sm:$0xff] }
  0x91   :  { %v602_v8 = vmin.f32 %v593_v44, 1.0  ;;  %882 = vst.msk [vmem:[%s2204_s3 + $0x180] sm:$0xff] %vm176_vm0, %v601_v48  ;;  %v594_v54 = vmax.f32 %v585_v50, 0.0  ;;  %v586_v55 = vadd.f32 %v577_v18, %v567_v51  ;;  %v1817_v30 = vstv %s1766_s16  ;;  %v1953_v48 = vld [vmem:[%s2203_s2 + $0xb0] sm:$0xff]  ;;  %v1960_v51 = vld [vmem:[%s2203_s2 + $0x28] sm:$0xff] }
  0x92   :  { %v550_v58 = vadd.f32 %v1703_v32, %v540_v63  ;;  %v568_v36 = vadd.f32 %v559_v49, %v549_v53  ;;  %v618_v40 = vmul.f32 %v1826_v37, %v1817_v30  ;;  %v1831_v46 = vstv %s1774_s18  ;;  %v1946_v49 = vld [vmem:[%s2203_s2 + $0x68] sm:$0xff] }
  0x93   :  { %883 = vst.msk [vmem:[%s2204_s3 + $0x188] sm:$0xff] %vm176_vm0, %v602_v8  ;;  %v1834_v47 = vstv %s1772_s17  ;;  %v603_v32 = vmin.f32 %v594_v54, 1.0  ;;  %v595_v59 = vmax.f32 %v586_v55, 0.0  ;;  %v1845_v13 = vstv %s1787_s0  ;;  %s1982_s17 = sld [smem:[#allocation4 + $0x7]] }
  0x94   :  { %v569_v60 = vadd.f32 %v560_v20, %v550_v58  ;;  %v638_v2 = vmul.f32 %v1839_v1, %v1834_v47  ;;  %v587_v3 = vadd.f32 %v578_v57, %v568_v36  ;;  %v628_v4 = vadd.f32 %v1831_v46, %v618_v40  ;;  %v1971_v58 = vld [vmem:[%s2203_s2 + $0x70] sm:$0xff]  ;;  %v1978_v40 = vld [vmem:[%s2203_s2 + $0xb8] sm:$0xff] }
  0x95   :  { %v619_v5 = vmul.f32 %v1850_v61, %v1817_v30  ;;  %884 = vst.msk [vmem:[%s2204_s3 + $0x190] sm:$0xff] %vm176_vm0, %v603_v32  ;;  %v604_v6 = vmin.f32 %v595_v59, 1.0  ;;  %v657_v7 = vmul.f32 %v1861_v62, %v1845_v13  ;;  %v639_v9 = vmul.f32 %v1868_v10, %v1834_v47 }
  0x96   :  { %v588_v56 = vadd.f32 %v579_v21, %v569_v60  ;;  %v596_v19 = vmax.f32 %v587_v3, 0.0  ;;  %v647_v52 = vadd.f32 %v638_v2, %v628_v4  ;;  %v658_v14 = vmul.f32 %v1876_v24, %v1845_v13  ;;  %v1991_v3 = vld [vmem:[%s2203_s2 + $0x30] sm:$0xff] }
  0x97   :  { %v629_v11 = vadd.f32 %v1831_v46, %v619_v5  ;;  %885 = vst.msk [vmem:[%s2204_s3 + $0x198] sm:$0xff] %vm176_vm0, %v604_v6  ;;  %v620_v17 = vmul.f32 %v1887_v16, %v1817_v30  ;;  %v640_v15 = vmul.f32 %v1894_v22, %v1834_v47  ;;  %v659_v27 = vmul.f32 %v1901_v26, %v1845_v13 }
  0x98   :  { %v597_v25 = vmax.f32 %v588_v56, 0.0  ;;  %v605_v33 = vmin.f32 %v596_v19, 1.0  ;;  %v666_v23 = vadd.f32 %v657_v7, %v647_v52  ;;  %v621_v35 = vmul.f32 %v1908_v29, %v1817_v30  ;;  %v2002_v56 = vld [vmem:[%s2203_s2 + $0x78] sm:$0xff] }
  0x99   :  { %v648_v28 = vadd.f32 %v639_v9, %v629_v11  ;;  %v630_v12 = vadd.f32 %v1831_v46, %v620_v17  ;;  %v641_v41 = vmul.f32 %v1916_v34, %v1834_v47  ;;  %v660_v18 = vmul.f32 %v1923_v39, %v1845_v13  ;;  %v2009_v9 = vld [vmem:[%s2203_s2 + $0xc0] sm:$0xff] }
  0x9a   :  { %v606_v38 = vmin.f32 %v597_v25, 1.0  ;;  %886 = vst.msk [vmem:[%s2204_s3 + $0x1a0] sm:$0xff] %vm176_vm0, %v605_v33  ;;  %v675_v43 = vmax.f32 %v666_v23, 0.0  ;;  %v631_v45 = vadd.f32 %v1831_v46, %v621_v35  ;;  %v622_v44 = vmul.f32 %v1935_v31, %v1817_v30  ;;  %v2021_v25 = vld [vmem:[%s2203_s2 + $0x38] sm:$0xff]  ;;  %v2028_v33 = vld [vmem:[%s2203_s2 + $0x80] sm:$0xff] }
  0x9b   :  { %v667_v42 = vadd.f32 %v658_v14, %v648_v28  ;;  %v649_v0 = vadd.f32 %v640_v15, %v630_v12  ;;  %v642_v57 = vmul.f32 %v1946_v49, %v1834_v47  ;;  %v661_v50 = vmul.f32 %v1953_v48, %v1845_v13  ;;  %v2035_v28 = vld [vmem:[%s2203_s2 + $0xc8] sm:$0xff] }
  0x9c   :  { %887 = vst.msk [vmem:[%s2204_s3 + $0x1a8] sm:$0x3] %vm185_vm1, %v606_v38  ;;  %v623_v63 = vmul.f32 %v1960_v51, %v1817_v30  ;;  %v684_v8 = vmin.f32 %v675_v43, 1.0  ;;  %v650_v20 = vadd.f32 %v641_v41, %v631_v45  ;;  %v632_v21 = vadd.f32 %v1831_v46, %v622_v44  ;;  %v2054_v44 = vld [vmem:[%s2203_s2 + $0x88] sm:$0x3] }
  0x9d   :  { %v676_v53 = vmax.f32 %v667_v42, 0.0  ;;  %v668_v54 = vadd.f32 %v659_v27, %v649_v0  ;;  %v643_v36 = vmul.f32 %v1971_v58, %v1834_v47  ;;  %v662_v32 = vmul.f32 %v1978_v40, %v1845_v13  ;;  %v2047_v42 = vld [vmem:[%s2203_s2 + $0x40] sm:$0x3] }
  0x9e   :  { %v633_v55 = vadd.f32 %v1831_v46, %v623_v63  ;;  %888 = vst.msk [vmem:[%s2204_s3 + $0x1b0] sm:$0xff] %vm176_vm0, %v684_v8  ;;  %v669_v60 = vadd.f32 %v660_v18, %v650_v20  ;;  %v651_v2 = vadd.f32 %v642_v57, %v632_v21  ;;  %v624_v4 = vmul.f32 %v1991_v3, %v1817_v30  ;;  %v2061_v57 = vld [vmem:[%s2203_s2 + $0xd0] sm:$0x3] }
  0x9f   :  { %v685_v59 = vmin.f32 %v676_v53, 1.0  ;;  %v677_v5 = vmax.f32 %v668_v54, 0.0  ;;  %v644_v7 = vmul.f32 %v2002_v56, %v1834_v47  ;;  %v663_v19 = vmul.f32 %v2009_v9, %v1845_v13 }
  0xa0   :  { %v652_v6 = vadd.f32 %v643_v36, %v633_v55  ;;  %v678_v52 = vmax.f32 %v669_v60, 0.0  ;;  %v670_v11 = vadd.f32 %v661_v50, %v651_v2  ;;  %v634_v14 = vadd.f32 %v1831_v46, %v624_v4 }
  0xa1   :  { %889 = vst.msk [vmem:[%s2204_s3 + $0x1b8] sm:$0xff] %vm176_vm0, %v685_v59  ;;  %v625_v17 = vmul.f32 %v2021_v25, %v1817_v30  ;;  %v686_v15 = vmin.f32 %v677_v5, 1.0  ;;  %v645_v23 = vmul.f32 %v2028_v33, %v1834_v47  ;;  %v664_v35 = vmul.f32 %v2035_v28, %v1845_v13 }
  0xa2   :  { %v671_v27 = vadd.f32 %v662_v32, %v652_v6  ;;  %v687_v38 = vmin.f32 %v678_v52, 1.0  ;;  %v679_v12 = vmax.f32 %v670_v11, 0.0  ;;  %v653_v41 = vadd.f32 %v644_v7, %v634_v14 }
  0xa3   :  { %v635_v18 = vadd.f32 %v1831_v46, %v625_v17  ;;  %890 = vst.msk [vmem:[%s2204_s3 + $0x1c0] sm:$0xff] %vm176_vm0, %v686_v15  ;;  %v626_v45 = vmul.f32 %v2047_v42, %v1817_v30  ;;  %v646_v0 = vmul.f32 %v2054_v44, %v1834_v47  ;;  %v665_v50 = vmul.f32 %v2061_v57, %v1845_v13 }
  0xa4   :  { %v680_v43 = vmax.f32 %v671_v27, 0.0  ;;  %891 = vst.msk [vmem:[%s2204_s3 + $0x1c8] sm:$0xff] %vm176_vm0, %v687_v38  ;;  %v688_v30 = vmin.f32 %v679_v12, 1.0  ;;  %v672_v63 = vadd.f32 %v663_v19, %v653_v41  ;;  %v2070_v53 = vstv %s1965_s12 }
  0xa5   :  { %v654_v8 = vadd.f32 %v645_v23, %v635_v18  ;;  %v636_v20 = vadd.f32 %v1831_v46, %v626_v45  ;;  %v704_v21 = vmul.f32 %v1826_v37, %v2070_v53  ;;  %v2076_v54 = vstv %s1982_s17 }
  0xa6   :  { %v689_v47 = vmin.f32 %v680_v43, 1.0  ;;  %892 = vst.msk [vmem:[%s2204_s3 + $0x1d0] sm:$0xff] %vm176_vm0, %v688_v30  ;;  %v681_v13 = vmax.f32 %v672_v63, 0.0  ;;  %v2083_v36 = vstv %s1995_s1  ;;  %v2086_v32 = vstv %s1997_s21 }
  0xa7   :  { %v673_v55 = vadd.f32 %v664_v35, %v654_v8  ;;  %v655_v46 = vadd.f32 %v646_v0, %v636_v20  ;;  %v714_v37 = vadd.f32 %v2076_v54, %v704_v21  ;;  %v724_v59 = vmul.f32 %v1839_v1, %v2083_v36 }
  0xa8   :  { %893 = vst.msk [vmem:[%s2204_s3 + $0x1d8] sm:$0xff] %vm176_vm0, %v689_v47  ;;  %v743_v60 = vmul.f32 %v1861_v62, %v2086_v32  ;;  %v690_v2 = vmin.f32 %v681_v13, 1.0  ;;  %v705_v5 = vmul.f32 %v1850_v61, %v2070_v53  ;;  %v725_v6 = vmul.f32 %v1868_v10, %v2083_v36 }
  0xa9   :  { %v682_v4 = vmax.f32 %v673_v55, 0.0  ;;  %v674_v7 = vadd.f32 %v665_v50, %v655_v46  ;;  %v733_v19 = vadd.f32 %v724_v59, %v714_v37  ;;  %v744_v52 = vmul.f32 %v1876_v24, %v2086_v32 }
  0xaa   :  { %v706_v11 = vmul.f32 %v1887_v16, %v2070_v53  ;;  %894 = vst.msk [vmem:[%s2204_s3 + $0x1e0] sm:$0xff] %vm176_vm0, %v690_v2  ;;  %v715_v62 = vadd.f32 %v2076_v54, %v705_v5  ;;  %v726_v61 = vmul.f32 %v1894_v22, %v2083_v36  ;;  %v745_v10 = vmul.f32 %v1901_v26, %v2086_v32 }
  0xab   :  { %v691_v1 = vmin.f32 %v682_v4, 1.0  ;;  %v683_v14 = vmax.f32 %v674_v7, 0.0  ;;  %v752_v17 = vadd.f32 %v743_v60, %v733_v19  ;;  %v707_v16 = vmul.f32 %v1908_v29, %v2070_v53 }
  0xac   :  { %v716_v24 = vadd.f32 %v2076_v54, %v706_v11  ;;  %v734_v15 = vadd.f32 %v725_v6, %v715_v62  ;;  %v727_v27 = vmul.f32 %v1916_v34, %v2083_v36  ;;  %v746_v22 = vmul.f32 %v1923_v39, %v2086_v32 }
  0xad   :  { %895 = vst.msk [vmem:[%s2204_s3 + $0x1e8] sm:$0xff] %vm176_vm0, %v691_v1  ;;  %v708_v26 = vmul.f32 %v1935_v31, %v2070_v53  ;;  %v692_v23 = vmin.f32 %v683_v14, 1.0  ;;  %v761_v35 = vmax.f32 %v752_v17, 0.0  ;;  %v717_v29 = vadd.f32 %v2076_v54, %v707_v16 }
  0xae   :  { %v735_v38 = vadd.f32 %v726_v61, %v716_v24  ;;  %v753_v12 = vadd.f32 %v744_v52, %v734_v15  ;;  %v728_v18 = vmul.f32 %v1946_v49, %v2083_v36  ;;  %v747_v34 = vmul.f32 %v1953_v48, %v2086_v32 }
  0xaf   :  { %v718_v41 = vadd.f32 %v2076_v54, %v708_v26  ;;  %896 = vst.msk [vmem:[%s2204_s3 + $0x1f0] sm:$0x3] %vm185_vm1, %v692_v23  ;;  %v770_v39 = vmin.f32 %v761_v35, 1.0  ;;  %v736_v43 = vadd.f32 %v727_v27, %v717_v29  ;;  %v709_v45 = vmul.f32 %v1960_v51, %v2070_v53 }
  0xb0   :  { %v754_v31 = vadd.f32 %v745_v10, %v735_v38  ;;  %v762_v0 = vmax.f32 %v753_v12, 0.0  ;;  %v729_v30 = vmul.f32 %v1971_v58, %v2083_v36  ;;  %v748_v49 = vmul.f32 %v1978_v40, %v2086_v32 }
  0xb1   :  { %v737_v50 = vadd.f32 %v728_v18, %v718_v41  ;;  %897 = vst.msk [vmem:[%s2204_s3 + $0x1f8] sm:$0xff] %vm176_vm0, %v770_v39  ;;  %v755_v63 = vadd.f32 %v746_v22, %v736_v43  ;;  %v719_v8 = vadd.f32 %v2076_v54, %v709_v45  ;;  %v710_v51 = vmul.f32 %v1991_v3, %v2070_v53 }
  0xb2   :  { %v763_v48 = vmax.f32 %v754_v31, 0.0  ;;  %v771_v47 = vmin.f32 %v762_v0, 1.0  ;;  %v730_v58 = vmul.f32 %v2002_v56, %v2083_v36  ;;  %v749_v40 = vmul.f32 %v2009_v9, %v2086_v32 }
  0xb3   :  { %v756_v20 = vadd.f32 %v747_v34, %v737_v50  ;;  %v764_v13 = vmax.f32 %v755_v63, 0.0  ;;  %v738_v55 = vadd.f32 %v729_v30, %v719_v8  ;;  %v720_v46 = vadd.f32 %v2076_v54, %v710_v51 }
  0xb4   :  { %v772_v21 = vmin.f32 %v763_v48, 1.0  ;;  %898 = vst.msk [vmem:[%s2204_s3 + $0x200] sm:$0xff] %vm176_vm0, %v771_v47  ;;  %v711_v3 = vmul.f32 %v2021_v25, %v2070_v53  ;;  %v731_v56 = vmul.f32 %v2028_v33, %v2083_v36  ;;  %v712_v2 = vmul.f32 %v2047_v42, %v2070_v53 }
  0xb5   :  { %v765_v37 = vmax.f32 %v756_v20, 0.0  ;;  %v773_v9 = vmin.f32 %v764_v13, 1.0  ;;  %v757_v59 = vadd.f32 %v748_v49, %v738_v55  ;;  %v739_v60 = vadd.f32 %v730_v58, %v720_v46 }
  0xb6   :  { %899 = vst.msk [vmem:[%s2204_s3 + $0x208] sm:$0xff] %vm176_vm0, %v772_v21  ;;  %v721_v5 = vadd.f32 %v2076_v54, %v711_v3  ;;  %v750_v25 = vmul.f32 %v2035_v28, %v2086_v32  ;;  %v732_v33 = vmul.f32 %v2054_v44, %v2083_v36  ;;  %v722_v19 = vadd.f32 %v2076_v54, %v712_v2 }
  0xb7   :  { %v774_v4 = vmin.f32 %v765_v37, 1.0  ;;  %900 = vst.msk [vmem:[%s2204_s3 + $0x210] sm:$0xff] %vm176_vm0, %v773_v9  ;;  %v766_v6 = vmax.f32 %v757_v59, 0.0  ;;  %v758_v7 = vadd.f32 %v749_v40, %v739_v60  ;;  %v751_v42 = vmul.f32 %v2061_v57, %v2086_v32 }
  0xb8   :  { %v740_v28 = vadd.f32 %v731_v56, %v721_v5  ;;  %v741_v36 = vadd.f32 %v732_v33, %v722_v19 }
  0xb9   :  { %901 = vst.msk [vmem:[%s2204_s3 + $0x218] sm:$0xff] %vm176_vm0, %v774_v4  ;;  %v775_v53 = vmin.f32 %v766_v6, 1.0  ;;  %v767_v44 = vmax.f32 %v758_v7, 0.0 }
  0xba   :  { %v759_v52 = vadd.f32 %v750_v25, %v740_v28  ;;  %v760_v54 = vadd.f32 %v751_v42, %v741_v36 }
  0xbb   :  { %902 = vst.msk [vmem:[%s2204_s3 + $0x220] sm:$0xff] %vm176_vm0, %v775_v53  ;;  %v776_v11 = vmin.f32 %v767_v44, 1.0 }
  0xbc   :  { %v768_v1 = vmax.f32 %v759_v52, 0.0  ;;  %v769_v57 = vmax.f32 %v760_v54, 0.0 }
  0xbd   :  { %903 = vst.msk [vmem:[%s2204_s3 + $0x228] sm:$0xff] %vm176_vm0, %v776_v11 }
  0xbe   :  { %v777_v32 = vmin.f32 %v768_v1, 1.0  ;;  %v778_v62 = vmin.f32 %v769_v57, 1.0 }
  0xc0   :  { %904 = vst.msk [vmem:[%s2204_s3 + $0x230] sm:$0xff] %vm176_vm0, %v777_v32 }
  0xc1   :  { %905 = vst.msk [vmem:[%s2204_s3 + $0x238] sm:$0x3] %vm185_vm1, %v778_v62 }
  0xc2   :  { %793 = vsyncpa [#allocation3], 1 }
  0xc3   :  { %794 = vsyncpa [#allocation5], 1 }

</bundles_post_ra>
